<compile_context>
chip_gen: v5e
topology: v5e:2x2
jax: 0.10.0
libtpu: 0.0.40
codegen_flags: <defaults>
</compile_context>

<pallas_src>
import jax
import jax.numpy as jnp
from jax.experimental import pallas as pl
from jax.experimental.pallas import tpu as pltpu

_LANE_CANDIDATES = (32768, 16384, 8192, 4096, 2048, 1024, 512, 256, 128)
_PAD_MULTIPLE = 1024


def _swish_kernel(x_ref, o_ref):
    x = x_ref[...]
    # swish(x) = x * sigmoid(x) = x * 0.5 * (tanh(x/2) + 1)
    # tanh form: single EUP push per element, VALU does the rest; stable for
    # all x (no exp overflow path). Computed natively in the input dtype.
    o_ref[...] = (x * (0.5 * (jnp.tanh(0.5 * x) + 1.0))).astype(o_ref.dtype)


def _is_v7x() -> bool:
    try:
        return "v7" in jax.devices()[0].device_kind.lower()
    except Exception:
        return False


def swish(x, *, target_block_bytes=None):
    """Elementwise swish via Pallas. Layout-agnostic (flattens the input)."""
    orig_shape = x.shape
    orig_dtype = x.dtype
    n = x.size
    if n == 0:
        return x

    v7x = _is_v7x()
    if target_block_bytes is None:
        # ~4 MiB blocks on v7x (halves per-step fixed overhead at 3.2 TB/s),
        # ~2 MiB elsewhere (already ~85% of roofline on v5e/v6e).
        target_block_bytes = (4 if v7x else 2) * 1024 * 1024

    # Compute in the input dtype for floats (bf16-native VALU/EUP on v6e/v7x);
    # non-float inputs fall back to f32 compute with a cast back.
    if not jnp.issubdtype(orig_dtype, jnp.floating):
        # TODO(synk): torch.sigmoid raises on integer tensors; this f32
        # cast-through path has no reference semantics.
        x = x.astype(jnp.float32)

    itemsize = jnp.dtype(x.dtype).itemsize

    # Flatten; pad at most to the next multiple of 1024 so the lane dim is
    # always >= 1024 (lane-dense, unmasked vst bursts). Common path
    # (n % 1024 == 0): no pad, no trailing slice.
    x_flat = jnp.ravel(x)
    n_pad = ((n + _PAD_MULTIPLE - 1) // _PAD_MULTIPLE) * _PAD_MULTIPLE
    if n_pad != n:
        x_flat = jnp.pad(x_flat, (0, n_pad - n))

    # Widest lane (last) dim dividing n_pad; guaranteed >= 1024 by padding.
    lane = 128
    for cand in _LANE_CANDIDATES:
        if n_pad % cand == 0:
            lane = cand
            break

    rows = n_pad // lane
    x2d = x_flat.reshape(rows, lane)

    # Block rows: multiple of 8 (sublane constraint), sized to the per-chip
    # byte target. Ragged last block is handled by Pallas masking.
    tile_rows = max(8, (target_block_bytes // (lane * itemsize)) // 8 * 8)
    if v7x:
        # Keep >= 4 grid steps when the slab is big enough so both TCs get
        # >= 2 pipelined steps each under dimension_semantics=("parallel",).
        cap = ((pl.cdiv(rows, 4) + 7) // 8) * 8
        tile_rows = min(tile_rows, max(cap, 8))
    if tile_rows >= rows:
        tile_rows = rows  # single full-extent block: always legal

    grid = (pl.cdiv(rows, tile_rows),)

    out2d = pl.pallas_call(
        _swish_kernel,
        out_shape=jax.ShapeDtypeStruct((rows, lane), x.dtype),
        grid_spec=pltpu.PrefetchScalarGridSpec(
            num_scalar_prefetch=0,
            grid=grid,
            in_specs=[pl.BlockSpec((tile_rows, lane), lambda i: (i, 0))],
            out_specs=pl.BlockSpec((tile_rows, lane), lambda i: (i, 0)),
        ),
        compiler_params=pltpu.CompilerParams(
            dimension_semantics=("parallel",)
        ),
        cost_estimate=pl.CostEstimate(
            flops=4 * n_pad,
            transcendentals=n_pad,
            bytes_accessed=2 * n_pad * itemsize,
        ),
    )(x2d)

    out_flat = out2d.reshape(n_pad)
    if n_pad != n:
        out_flat = out_flat[:n]
    return out_flat.reshape(orig_shape).astype(orig_dtype)


if __name__ == "__main__":
    key = jax.random.PRNGKey(0)
    # Small NCHW-style activation input: (2, 4, 16, 16)
    x = jax.random.normal(key, (2, 4, 16, 16), dtype=jnp.float32)

    y = swish(x)
    y = jax.block_until_ready(y)

    # Correctness check against pure-JAX reference (tanh form vs exp-based
    # sigmoid differ only by a few ULPs).
    y_ref = x * jax.nn.sigmoid(x)
    assert y.shape == x.shape and y.dtype == x.dtype
    assert jnp.allclose(y, y_ref, atol=1e-5, rtol=1e-5)

    print("KERNEL_OK")
</pallas_src>

<mosaic_0001>
module attributes {stable_mosaic.version = 11 : i64} {
  func.func @_swish_kernel(%arg0: i32, %arg1: memref<1x2048xf32, #tpu.memory_space<vmem>>, %arg2: memref<1x2048xf32, #tpu.memory_space<vmem>>) attributes {dimension_semantics = [#tpu.dimension_semantics<parallel>], iteration_bounds = array<i64: 1>, scalar_prefetch = 0 : i64, scratch_operands = 0 : i64, tpu.core_type = #tpu.core_type<tc>, window_params = [{transform_indices = @transform_0, window_bounds = array<i64: 1, 2048>}, {transform_indices = @transform_1, window_bounds = array<i64: 1, 2048>}]} {
    %c0 = arith.constant 0 : index
    %c0_0 = arith.constant 0 : index
    %0 = vector.load %arg1[%c0, %c0_0] : memref<1x2048xf32, #tpu.memory_space<vmem>>, vector<1x2048xf32>
    %cst = arith.constant 5.000000e-01 : f32
    %1 = vector.broadcast %cst : f32 to vector<1x2048xf32>
    %2 = arith.mulf %1, %0 : vector<1x2048xf32>
    %3 = math.tanh %2 : vector<1x2048xf32>
    %cst_1 = arith.constant 1.000000e+00 : f32
    %4 = vector.broadcast %cst_1 : f32 to vector<1x2048xf32>
    %5 = arith.addf %3, %4 : vector<1x2048xf32>
    %cst_2 = arith.constant 5.000000e-01 : f32
    %6 = vector.broadcast %cst_2 : f32 to vector<1x2048xf32>
    %7 = arith.mulf %6, %5 : vector<1x2048xf32>
    %8 = arith.mulf %0, %7 : vector<1x2048xf32>
    %c0_3 = arith.constant 0 : index
    %c0_4 = arith.constant 0 : index
    %9 = vector.load %arg2[%c0_3, %c0_4] : memref<1x2048xf32, #tpu.memory_space<vmem>>, vector<1x2048xf32>
    tpu.vector_store %arg2[%c0_3, %c0_4], %8 {strides = array<i32>} : memref<1x2048xf32, #tpu.memory_space<vmem>>, vector<1x2048xf32>,
    return
  }
  func.func @transform_0(%arg0: i32) -> (i32, i32) {
    %c0_i32 = arith.constant 0 : i32
    %c0_i32_0 = arith.constant 0 : i32
    return %arg0, %c0_i32 : i32, i32
  }
  func.func @transform_1(%arg0: i32) -> (i32, i32) {
    %c0_i32 = arith.constant 0 : i32
    %c0_i32_0 = arith.constant 0 : i32
    return %arg0, %c0_i32 : i32, i32
  }
}

</mosaic_0001>

<bundles_post_ra>
// kernel: tpu_custom_call.1
= control target key start
LH: loop header
LB: loop body
LE: loop exit
PB: predicated region body
PF: predicated region fallthrough
CT: control target
= control target key end

     0   :  { %6 = vsyncpa [#allocation3], 0  ;;  %s130_s0 = inlined_call_operand.hbm [shape: f32[1,2048], index: 0, kind: input, shape index: {}]   ;;  %s131_s1 = inlined_call_operand.hbm [shape: f32[1,2048], index: 1, kind: output, shape index: {}]  }
   0x1   :  { %7 = vsyncpa [#allocation4], 0  ;;  %s13_s8 = sshll.u32 %s130_s0, 4  ;;  %s112_s9 = smov [#allocation2]   ;;  %s14_s8 = int_to_ptr.hbm [resolvable:$true] %s13_s8 }
   0x2   :  { %s15_s10 = sshll.u32 %s112_s9, 4  ;;  %s16_s10 = int_to_ptr.vmem [resolvable:$true] %s15_s10 }
   0x3   :  { %18 = dma.hbm_to_vmem [thread:$0]  %s14_s8, 256, %s16_s10, [#allocation3]  }
   0x4   :  { %108 = dma.done.wait [#allocation3], 256  }
   0x5   :  { %109 = vsyncadd [#allocation3], 4294967040  ;;  %v23_v0 = vld [vmem:[#allocation2] sm:$0xff]  ;;  %v24_v1 = vld [vmem:[#allocation2 + $0x8] sm:$0xff]  ;;  %s113_s11 = smov [#allocation5]   ;;  %s44_s14 = sshll.u32 %s131_s1, 4  ;;  %s45_s14 = int_to_ptr.hbm [resolvable:$true] %s44_s14 }
   0x6   :  { %v25_v2 = vmul.f32 0.5, %v23_v0  ;;  %v26_v3 = vmul.f32 0.5, %v24_v1  ;;  %s42_s0 = sshll.u32 %s113_s11, 4  ;;  %s43_s0 = int_to_ptr.vmem [resolvable:$true] %s42_s0 }
   0x8   :  { %56 = vtanh.f32 %v25_v2 }
   0x9   :  { %58 = vtanh.f32 %v26_v3 }
   0xe   :  { %v57_v4 = vpop.eup %56 }
   0xf   :  { %v59_v5 = vpop.eup %58  ;;  %v29_v6 = vadd.f32 1.0, %v57_v4 }
  0x10   :  { %v30_v7 = vadd.f32 1.0, %v59_v5 }
  0x11   :  { %v31_v8 = vmul.f32 0.5, %v29_v6 }
  0x12   :  { %v32_v9 = vmul.f32 0.5, %v30_v7 }
  0x13   :  { %v33_v10 = vmul.f32 %v31_v8, %v23_v0 }
  0x14   :  { %v34_v11 = vmul.f32 %v32_v9, %v24_v1 }
  0x15   :  { %35 = vst [vmem:[#allocation5] sm:$0xff] %v33_v10 }
  0x16   :  { %36 = vst [vmem:[#allocation5 + $0x8] sm:$0xff] %v34_v11 }
  0x17   :  { %47 = dma.vmem_to_hbm [thread:$0]  %s43_s0, 256, %s45_s14, [#allocation4]  }
  0x18   :  { %110 = dma.done.wait [#allocation4], 256  }
  0x19   :  { %111 = vsyncadd [#allocation4], 4294967040 }
  0x1a   :  { %52 = vsyncpa [#allocation3], 1 }
  0x1b   :  { %53 = vsyncpa [#allocation4], 1 }

</bundles_post_ra>
